<compile_context>
chip_gen: v5e
topology: v5e:2x2
jax: 0.10.0
libtpu: 0.0.40
codegen_flags: <defaults>
</compile_context>

<pallas_src>
import jax
import jax.numpy as jnp
from jax.experimental import pallas as pl
from jax.experimental.pallas import tpu as pltpu


def _round_up(x, m):
    return ((x + m - 1) // m) * m


def _fused_linear_kernel(x_ref, w_ref, o_ref):
    # One row tile of the block-diagonal matmul: [TM, D_aug] @ [D_aug, H].
    # Per-key bias is folded into W via the per-key ones columns of x.
    o_ref[...] = jnp.dot(
        x_ref[...], w_ref[...], preferred_element_type=jnp.float32
    ).astype(o_ref.dtype)


def fused_initial_linear(x_aug, w_big, *, row_tile=512):
    """y = x_aug @ w_big as a row-tiled, megacore-parallel Pallas kernel.

    x_aug: [N, D_aug]  packed features (+ per-key ones columns), streamed
    w_big: [D_aug, H]  stacked per-key weights (+ biases), VMEM-resident
    returns [N, H] in x_aug.dtype; f32 accumulation on the MXU.
    """
    n, d_aug = x_aug.shape
    d_w, h = w_big.shape
    assert d_aug == d_w, (d_aug, d_w)
    out_dtype = x_aug.dtype

    tm = row_tile
    if n <= tm:
        tm = n if n % 8 == 0 else _round_up(n, 8)
    grid = (pl.cdiv(n, tm),)

    itemsize = jnp.dtype(out_dtype).itemsize
    flops = 2 * n * d_aug * h
    bytes_accessed = (n * d_aug + d_aug * h + n * h) * itemsize
    # double-buffered x & out tiles + (double-buffered) resident W + headroom
    vmem_bytes = (2 * tm * d_aug + 2 * tm * h + 2 * d_aug * h) * itemsize
    vmem_limit = int(min(32 << 20, max(16 << 20, 4 * vmem_bytes)))

    return pl.pallas_call(
        _fused_linear_kernel,
        out_shape=jax.ShapeDtypeStruct((n, h), out_dtype),
        grid=grid,
        in_specs=[
            pl.BlockSpec((tm, d_aug), lambda i: (i, 0)),   # streamed row tiles
            pl.BlockSpec((d_aug, h), lambda i: (0, 0)),    # resident weights
        ],
        out_specs=pl.BlockSpec((tm, h), lambda i: (i, 0)),
        compiler_params=pltpu.CompilerParams(
            dimension_semantics=("parallel",),             # megacore over rows
            vmem_limit_bytes=vmem_limit,
        ),
        cost_estimate=pl.CostEstimate(
            flops=flops, transcendentals=0, bytes_accessed=bytes_accessed
        ),
    )(x_aug, w_big)


class InitialLayerPallas:
    """JAX/Pallas port of InitialLayer (merge_op='concat', torch.cat dim=0)."""

    def __init__(self, feat_dim, hidden_dim, merge_op="concat", key=None,
                 io_dtype=jnp.float32, row_tile=512):
        assert merge_op == "concat"
        self._feat_dim = dict(feat_dim)
        self._hidden_dim = hidden_dim
        self._merge_op = merge_op
        self._io_dtype = jnp.dtype(io_dtype)
        self._row_tile = row_tile

        names = list(self._feat_dim.keys())      # dict order == ModuleDict order
        self._names = names
        if isinstance(hidden_dim, int):
            h_per_key = {n: hidden_dim for n in names}
        else:
            h_per_key = dict(hidden_dim)
            # torch.cat(dim=0) requires every per-key output width to match.
            assert len(set(h_per_key.values())) == 1, \
                "concat along dim=0 needs equal hidden dims"
        self._h = int(h_per_key[names[0]])

        if key is None:
            key = jax.random.PRNGKey(0)

        # Master f32 parameters (nn.Linear-like fan-in init scale).
        self.params = {}
        for idx, name in enumerate(names):
            in_dim = self._feat_dim[name]
            kw, kb = jax.random.split(jax.random.fold_in(key, idx))
            bound = 1.0 / float(in_dim) ** 0.5
            w = jax.random.uniform(kw, (in_dim, self._h), jnp.float32, -bound, bound)
            b = jax.random.uniform(kb, (1, self._h), jnp.float32, -bound, bound)
            self.params[name] = (w, b)

        # Column-band offsets in the packed input.
        self._col_off = {}
        off = 0
        for name in names:
            self._col_off[name] = off
            off += self._feat_dim[name]
        self._d_sum = off
        self._d_aug = self._d_sum + len(names)   # + one bias ("ones") column per key

        # Pack W_k / b_k once into the block-diagonal weight (io_dtype).
        w_big = jnp.zeros((self._d_aug, self._h), jnp.float32)
        for gi, name in enumerate(names):
            w, b = self.params[name]
            c0 = self._col_off[name]
            w_big = w_big.at[c0:c0 + self._feat_dim[name], :].set(w)
            w_big = w_big.at[self._d_sum + gi, :].set(b[0])
        self.w_big = w_big.astype(self._io_dtype)

    def get_out_dim(self):
        # NOTE: mirrors the PyTorch source's bookkeeping (feature-dim concat),
        # even though forward() concatenates along dim=0 — inherited behavior.
        if isinstance(self._hidden_dim, int):
            return self._hidden_dim * len(self._feat_dim)
        return int(sum(self._hidden_dim.values()))

    def _pack_inputs(self, feat):
        """[sum_k N_k, D_aug]: each key's features in its column band + ones col."""
        g = len(self._names)
        parts = []
        for gi, name in enumerate(self._names):
            x = feat[name].astype(self._io_dtype)
            n, d = x.shape
            assert d == self._feat_dim[name]
            c0 = self._col_off[name]
            left = jnp.zeros((n, c0), self._io_dtype)
            right = jnp.zeros((n, self._d_sum - c0 - d), self._io_dtype)
            ones = jnp.zeros((n, g), self._io_dtype).at[:, gi].set(1)
            parts.append(jnp.concatenate([left, x, right, ones], axis=1))
        return jnp.concatenate(parts, axis=0)

    def __call__(self, feat):
        x_aug = self._pack_inputs(feat)
        return fused_initial_linear(x_aug, self.w_big, row_tile=self._row_tile)


if __name__ == "__main__":
    key = jax.random.PRNGKey(0)

    # Small synthetic config: two feature types with different input dims and
    # different row counts; H=128 keeps the output lane-dense.
    feat_dim = {"dense": 16, "sparse_kv": 24}
    hidden = 128
    n_dense, n_sparse = 40, 24

    k1, k2, kparam = jax.random.split(key, 3)
    feat = {
        "dense": jax.random.normal(k1, (n_dense, feat_dim["dense"]), jnp.float32),
        "sparse_kv": jax.random.normal(k2, (n_sparse, feat_dim["sparse_kv"]), jnp.float32),
    }

    # f32 path (matches the PyTorch module's dtype).
    layer = InitialLayerPallas(feat_dim, hidden, merge_op="concat", key=kparam)
    out = jax.block_until_ready(layer(feat))

    ref = jnp.concatenate(
        [feat[n] @ layer.params[n][0] + layer.params[n][1] for n in feat_dim],
        axis=0,
    )
    assert out.shape == (n_dense + n_sparse, hidden), out.shape
    # Tolerance accommodates MXU f32 matmul precision modes; still catches
    # any structural error (wrong band / missing bias -> O(0.1) errors).
    assert jnp.allclose(out, ref, atol=1e-2, rtol=1e-2), \
        float(jnp.max(jnp.abs(out - ref)))

    # bf16 streaming path (halves HBM traffic; f32 accumulation on the MXU).
    layer_bf16 = InitialLayerPallas(feat_dim, hidden, merge_op="concat",
                                    key=kparam, io_dtype=jnp.bfloat16)
    out_bf16 = jax.block_until_ready(layer_bf16(feat))
    assert out_bf16.shape == (n_dense + n_sparse, hidden)
    assert jnp.allclose(out_bf16.astype(jnp.float32), ref, atol=5e-2, rtol=5e-2)

    print("KERNEL_OK")
</pallas_src>

<mosaic_0001>
module attributes {stable_mosaic.version = 11 : i64} {
  func.func @_fused_linear_kernel(%arg0: i32, %arg1: memref<64x42xf32, #tpu.memory_space<vmem>>, %arg2: memref<42x128xf32, #tpu.memory_space<vmem>>, %arg3: memref<64x128xf32, #tpu.memory_space<vmem>>) attributes {dimension_semantics = [#tpu.dimension_semantics<parallel>], iteration_bounds = array<i64: 1>, scalar_prefetch = 0 : i64, scratch_operands = 0 : i64, tpu.core_type = #tpu.core_type<tc>, window_params = [{transform_indices = @transform_0, window_bounds = array<i64: 64, 42>}, {pipeline_mode = #tpu.pipeline_mode<synchronous>, transform_indices = @transform_1, window_bounds = array<i64: 42, 128>}, {transform_indices = @transform_2, window_bounds = array<i64: 64, 128>}]} {
    %c0 = arith.constant 0 : index
    %c0_0 = arith.constant 0 : index
    %0 = vector.load %arg1[%c0, %c0_0] : memref<64x42xf32, #tpu.memory_space<vmem>>, vector<64x42xf32>
    %c0_1 = arith.constant 0 : index
    %c0_2 = arith.constant 0 : index
    %1 = vector.load %arg2[%c0_1, %c0_2] : memref<42x128xf32, #tpu.memory_space<vmem>>, vector<42x128xf32>
    %cst = arith.constant dense<0.000000e+00> : vector<64x128xf32>
    %2 = tpu.matmul %0, %1, %cst {dimension_numbers = #tpu.dot_dimension_numbers<[1], [0], [0], [1], [0, 0, 1, 1], [], []>} : vector<64x42xf32>, vector<42x128xf32>, vector<64x128xf32> -> vector<64x128xf32>
    %c0_3 = arith.constant 0 : index
    %c0_4 = arith.constant 0 : index
    %3 = vector.load %arg3[%c0_3, %c0_4] : memref<64x128xf32, #tpu.memory_space<vmem>>, vector<64x128xf32>
    tpu.vector_store %arg3[%c0_3, %c0_4], %2 {strides = array<i32>} : memref<64x128xf32, #tpu.memory_space<vmem>>, vector<64x128xf32>,
    return
  }
  func.func @transform_0(%arg0: i32) -> (i32, i32) {
    %c0_i32 = arith.constant 0 : i32
    %c0_i32_0 = arith.constant 0 : i32
    return %arg0, %c0_i32 : i32, i32
  }
  func.func @transform_1(%arg0: i32) -> (i32, i32) {
    %c0_i32 = arith.constant 0 : i32
    %c0_i32_0 = arith.constant 0 : i32
    %c0_i32_1 = arith.constant 0 : i32
    return %c0_i32, %c0_i32_0 : i32, i32
  }
  func.func @transform_2(%arg0: i32) -> (i32, i32) {
    %c0_i32 = arith.constant 0 : i32
    %c0_i32_0 = arith.constant 0 : i32
    return %arg0, %c0_i32 : i32, i32
  }
}

</mosaic_0001>

<bundles_post_ra>
// kernel: tpu_custom_call.1
= control target key start
LH: loop header
LB: loop body
LE: loop exit
PB: predicated region body
PF: predicated region fallthrough
CT: control target
= control target key end

     0   :  { %vm51_vm0 = vcmask 1041408   ;;  %s249_s0 = inlined_call_operand.vmem [shape: f32[64,42], index: 0, kind: input, shape index: {}]   ;;  %s250_s1 = inlined_call_operand.vmem [shape: f32[42,128], index: 1, kind: input, shape index: {}]   ;;  %s251_s2 = inlined_call_operand.hbm [shape: f32[64,128], index: 2, kind: output, shape index: {}]  }
   0x1   :  { %v25_v0 = vld [vmem:[%s250_s1 + $0x28] sm:$0x3]  ;;  %v24_v1 = vld [vmem:[%s250_s1 + $0x20] sm:$0xff]  ;;  %v23_v2 = vld [vmem:[%s250_s1 + $0x18] sm:$0xff] }
   0x2   :  { %132 = vmatpush.msk.msra.mxu2 %vm51_vm0, %v25_v0  ;;  %133 = vmatpush.msk.msra.mxu3 %vm51_vm0, %v25_v0  ;;  %v22_v3 = vld [vmem:[%s250_s1 + $0x10] sm:$0xff] }
   0x3   :  { %122 = vmatpush.msk.msra.mxu0 %vm51_vm0, %v25_v0  ;;  %131 = vmatpush.msk.msra.mxu1 %vm51_vm0, %v25_v0 }
   0x4   :  { %135 = vmatpush.msra.mxu2 %v24_v1  ;;  %136 = vmatpush.msra.mxu3 %v24_v1 }
   0x5   :  { %66 = vmatpush.msra.mxu0 %v24_v1  ;;  %134 = vmatpush.msra.mxu1 %v24_v1 }
   0x6   :  { %7 = vsyncpa [#allocation3], 0  ;;  %138 = vmatpush.msra.mxu2 %v23_v2  ;;  %139 = vmatpush.msra.mxu3 %v23_v2  ;;  %v21_v4 = vld [vmem:[%s250_s1 + $0x8] sm:$0xff]  ;;  %v20_v5 = vld [vmem:[%s250_s1] sm:$0xff]  ;;  %vm26_vm1 = vcmask 343040   ;;  %s178_s8 = smov [#allocation2]  }
   0x7   :  { %67 = vmatpush.msra.mxu0 %v23_v2  ;;  %137 = vmatpush.msra.mxu1 %v23_v2  ;;  %v16_v6 = vld [vmem:[%s249_s0 + $0x20] sm:$0xff]  ;;  %v18_v7 = vld [vmem:[%s249_s0 + $0x30] sm:$0xff]  ;;  %v17_v10 = vld [vmem:[%s249_s0 + $0x28] sm:$0xff]  ;;  %s110_s11 = sshll.u32 %s251_s2, 4  ;;  %s179_s12 = smov 128   ;;  %s111_s11 = int_to_ptr.hbm [resolvable:$true] %s110_s11 }
   0x8   :  { %141 = vmatpush.msra.mxu2 %v22_v3  ;;  %142 = vmatpush.msra.mxu3 %v22_v3  ;;  %v12_v8 = vld [vmem:[%s249_s0] sm:$0xff]  ;;  %v14_v9 = vld [vmem:[%s249_s0 + $0x10] sm:$0xff]  ;;  %v19_v11 = vld [vmem:[%s249_s0 + $0x38] sm:$0xff]  ;;  %s180_s13 = smov 8  }
   0x9   :  { %68 = vmatpush.msra.mxu0 %v22_v3  ;;  %140 = vmatpush.msra.mxu1 %v22_v3  ;;  %v13_v12 = vld [vmem:[%s249_s0 + $0x8] sm:$0xff]  ;;  %v15_v13 = vld [vmem:[%s249_s0 + $0x18] sm:$0xff]  ;;  %s108_s0 = sshll.u32 %s178_s8, 4  ;;  %s109_s0 = int_to_ptr.vmem [resolvable:$true] %s108_s0 }
   0xa   :  { %144 = vmatpush.msra.mxu2 %v21_v4  ;;  %145 = vmatpush.msra.mxu3 %v21_v4 }
   0xb   :  { %69 = vmatpush.msra.mxu0 %v21_v4  ;;  %143 = vmatpush.msra.mxu1 %v21_v4 }
   0xc   :  { %147 = vmatpush.msra.mxu2 %v20_v5  ;;  %148 = vmatpush.msra.mxu3 %v20_v5 }
   0xd   :  { %127 = vmatmul.msk.f32.vlgmr.msra.gmra.mxu2 %vm26_vm1, %v16_v6  ;;  %129 = vmatmul.msk.f32.vlgmr.msra.gmra.mxu3 %vm26_vm1, %v18_v7 }
   0xe   :  { %70 = vmatpush.msra.mxu0 %v20_v5  ;;  %146 = vmatpush.msra.mxu1 %v20_v5 }
   0xf   :  { %123 = vmatmul.msk.f32.vlgmr.msra.gmra.mxu0 %vm26_vm1, %v12_v8  ;;  %125 = vmatmul.msk.f32.vlgmr.msra.gmra.mxu1 %vm26_vm1, %v14_v9 }
  0x15   :  { %128 = vmatmul.msk.f32.gmra.mxu2 %vm26_vm1, %v17_v10  ;;  %130 = vmatmul.msk.f32.gmra.mxu3 %vm26_vm1, %v19_v11 }
  0x17   :  { %124 = vmatmul.msk.f32.gmra.mxu0 %vm26_vm1, %v13_v12  ;;  %126 = vmatmul.msk.f32.gmra.mxu1 %vm26_vm1, %v15_v13 }
  0x8c   :  { %v72_v14 = vpop.f32.mrf.mxu0  ;;  %v78_v15 = vpop.f32.mrf.mxu1 }
  0x8d   :  { %96 = vst [vmem:[#allocation2] sm:$0xff] %v72_v14 }
  0x8e   :  { %98 = vst [vmem:[#allocation2 + $0x10] sm:$0xff] %v78_v15 }
  0x90   :  { %v84_v16 = vpop.f32.mrf.mxu2  ;;  %v90_v17 = vpop.f32.mrf.mxu3 }
  0x91   :  { %100 = vst [vmem:[#allocation2 + $0x20] sm:$0xff] %v84_v16 }
  0x92   :  { %102 = vst [vmem:[#allocation2 + $0x30] sm:$0xff] %v90_v17 }
  0x94   :  { %v75_v18 = vpop.f32.mrf.mxu0  ;;  %v81_v19 = vpop.f32.mrf.mxu1 }
  0x95   :  { %97 = vst [vmem:[#allocation2 + $0x8] sm:$0xff] %v75_v18 }
  0x96   :  { %99 = vst [vmem:[#allocation2 + $0x18] sm:$0xff] %v81_v19 }
  0x98   :  { %v87_v20 = vpop.f32.mrf.mxu2  ;;  %v93_v21 = vpop.f32.mrf.mxu3 }
  0x99   :  { %101 = vst [vmem:[#allocation2 + $0x28] sm:$0xff] %v87_v20 }
  0x9a   :  { %103 = vst [vmem:[#allocation2 + $0x38] sm:$0xff] %v93_v21 }
  0x9b   :  { %116 = dma.vmem_to_hbm [thread:$0]  %s109_s0, 1024, %s111_s11, [#allocation3], %s179_s12, %s179_s12, %s180_s13  }
  0x9c   :  { %176 = dma.done.wait [#allocation3], 1024  }
  0x9d   :  { %177 = vsyncadd [#allocation3], 4294966272 }
  0x9e   :  { %121 = vsyncpa [#allocation3], 1 }

</bundles_post_ra>
